<compile_context>
chip_gen: v6e
topology: v6e:2x2x1
jax: 0.10.0
libtpu: 0.0.40
codegen_flags: <defaults>
</compile_context>

<pallas_src>
import functools

import jax
import jax.numpy as jnp
from jax.experimental import pallas as pl
from jax.experimental.pallas import tpu as pltpu

_LANE = 128
_SUBLANE = 8


def _round_up(a, m):
    return ((a + m - 1) // m) * m


def _cmodel_kernel(x_ref, w1_ref, b1_ref, w2_ref, b2_ref, o_ref):
    x = x_ref[...]            # (TILE_B, F)       float32
    w1 = w1_ref[...]          # (F, H_pad)        float32
    n_features = w1.shape[0]

    # ---- Layer 1 on the VPU: h = relu(x @ W1 + b1), K = n_features is tiny ----
    # Two lane-broadcast FMAs instead of a padded K=2 MXU matmul.
    xcols = [x[:, f:f + 1] for f in range(n_features)]      # static tiny unroll
    wrows = [w1[f:f + 1, :] for f in range(n_features)]
    h = b1_ref[...] + xcols[0] * wrows[0]
    for xc, wr in zip(xcols[1:], wrows[1:]):
        h = h + xc * wr
    h = jnp.maximum(h, 0.0)                                  # (TILE_B, H_pad)

    # ---- Layer 2 on the MXU, bias folded into the single store ----------------
    out = jnp.dot(h, w2_ref[...], preferred_element_type=jnp.float32)
    o_ref[...] = (out + b2_ref[...]).astype(o_ref.dtype)


def init_cmodel_params(w1, b1, w2, b2):
    """Pad weights/biases once (hoisted out of the per-call path).

    w1: (F, H); b1: (H,); w2: (H, O); b2: (O,).  All padding is exact:
    relu(0) = 0 and the padded rows/columns of W2/b2 are zero.
    """
    F, H = w1.shape
    O = w2.shape[1]
    H_pad = _round_up(H, _LANE)
    O_wide = _round_up(O, _LANE)

    params = dict(
        n_features=F, n_hidden=H, n_output=O,
        w1p=jnp.pad(w1, ((0, 0), (0, H_pad - H))),                     # (F, H_pad)
        b1p=jnp.pad(b1.reshape(1, -1), ((0, 0), (0, H_pad - H))),      # (1, H_pad)
        # Lane-dense variant (unmasked stores) for small batches.
        w2_wide=jnp.pad(w2, ((0, H_pad - H), (0, O_wide - O))),        # (H_pad, 128)
        b2_wide=jnp.pad(b2.reshape(1, -1), ((0, 0), (0, O_wide - O))), # (1, 128)
        # Narrow variant (masked stores, 64x less writeback) for large batches.
        w2_narrow=jnp.pad(w2, ((0, H_pad - H), (0, 0))),               # (H_pad, O)
        b2_narrow=b2.reshape(1, -1),                                   # (1, O)
    )
    return jax.tree_util.tree_map(jax.block_until_ready, params)


@functools.partial(jax.jit, static_argnames=("tile_b", "n_out"))
def _cmodel_pallas(x, w1p, b1p, w2p, b2p, *, tile_b, n_out):
    B, F = x.shape
    H_pad = w1p.shape[1]
    O_cols = w2p.shape[1]

    num_tiles = pl.cdiv(B, tile_b)
    B_pad = num_tiles * tile_b
    xp = jnp.pad(x, ((0, B_pad - B), (0, 0))) if B_pad != B else x

    out_pad = pl.pallas_call(
        _cmodel_kernel,
        out_shape=jax.ShapeDtypeStruct((B_pad, O_cols), x.dtype),
        grid=(num_tiles,),
        in_specs=[
            pl.BlockSpec((tile_b, F), lambda i: (i, 0)),        # x: streamed
            pl.BlockSpec((F, H_pad), lambda i: (0, 0)),         # W1: resident
            pl.BlockSpec((1, H_pad), lambda i: (0, 0)),         # b1: resident
            pl.BlockSpec((H_pad, O_cols), lambda i: (0, 0)),    # W2: resident
            pl.BlockSpec((1, O_cols), lambda i: (0, 0)),        # b2: resident
        ],
        out_specs=pl.BlockSpec((tile_b, O_cols), lambda i: (i, 0)),
        compiler_params=pltpu.CompilerParams(
            dimension_semantics=("parallel",)),
    )(xp, w1p, b1p, w2p, b2p)

    return out_pad[:B, :n_out]


def cmodel_forward(x, params, *, tile_b=1024):
    """x: (B, F) float32; params from init_cmodel_params. Returns (B, n_output)."""
    B = x.shape[0]
    O = params["n_output"]

    # Batch tiling: sublane-aligned; large batches use big tiles (fewer ~0.35us
    # grid steps), but keep >= 2 steps once B >= 1024 so v7x can use both TCs.
    b_round = _round_up(B, _SUBLANE)
    tb = _round_up(max(_SUBLANE, min(tile_b, b_round)), _SUBLANE)
    if b_round >= 1024:
        tb = min(tb, _round_up(pl.cdiv(b_round, 2), _SUBLANE))

    # Output layout: lane-dense (128 lanes, unmasked vst) for small batches;
    # narrow (n_output lanes, masked vst) for large batches to cut writeback
    # bandwidth on v5e.  Both weight variants were padded once at init.
    if b_round < 2048:
        w2p, b2p = params["w2_wide"], params["b2_wide"]
    else:
        w2p, b2p = params["w2_narrow"], params["b2_narrow"]

    return _cmodel_pallas(x, params["w1p"], params["b1p"], w2p, b2p,
                          tile_b=tb, n_out=O)


def _reference(x, w1, b1, w2, b2):
    h = jnp.maximum(x @ w1 + b1[None, :], 0.0)
    return h @ w2 + b2[None, :]


if __name__ == "__main__":
    # Shapes implied by the module: features=2, the torch data is (200, 2)
    # (two clusters of 100 points around +2 and -2); hidden=32, output=2.
    n_features, n_hidden, n_output = 2, 32, 2

    key = jax.random.PRNGKey(0)
    k0, k1, kw1, kb1, kw2, kb2, kx = jax.random.split(key, 7)

    x0 = 2.0 + jax.random.normal(k0, (100, n_features), dtype=jnp.float32)
    x1 = -2.0 + jax.random.normal(k1, (100, n_features), dtype=jnp.float32)
    x = jnp.concatenate([x0, x1], axis=0)                       # (200, 2)

    # nn.Linear params (stored pre-transposed as (in, out), biases flat).
    w1 = jax.random.normal(kw1, (n_features, n_hidden), dtype=jnp.float32) * 0.1
    b1 = jax.random.normal(kb1, (n_hidden,), dtype=jnp.float32) * 0.1
    w2 = jax.random.normal(kw2, (n_hidden, n_output), dtype=jnp.float32) * 0.1
    b2 = jax.random.normal(kb2, (n_output,), dtype=jnp.float32) * 0.1

    params = init_cmodel_params(w1, b1, w2, b2)   # padding done once, off hot path

    # Small batch (the module's own data size): lane-dense output, single tile.
    out = jax.block_until_ready(cmodel_forward(x, params))
    ref = _reference(x, w1, b1, w2, b2)
    assert out.shape == (x.shape[0], n_output)
    assert jnp.allclose(out, ref, atol=1e-5, rtol=1e-5)

    # Large batch: exercises the multi-step grid + narrow-output (masked store)
    # path used on bandwidth-poor parts.
    xl = jax.random.normal(kx, (4096, n_features), dtype=jnp.float32)
    out_l = jax.block_until_ready(cmodel_forward(xl, params))
    ref_l = _reference(xl, w1, b1, w2, b2)
    assert out_l.shape == (xl.shape[0], n_output)
    assert jnp.allclose(out_l, ref_l, atol=1e-5, rtol=1e-5)

    print("KERNEL_OK")
</pallas_src>

<mosaic_0001>
module attributes {stable_mosaic.version = 11 : i64} {
  func.func @_cmodel_kernel(%arg0: i32, %arg1: memref<200x2xf32, #tpu.memory_space<vmem>>, %arg2: memref<2x128xf32, #tpu.memory_space<vmem>>, %arg3: memref<1x128xf32, #tpu.memory_space<vmem>>, %arg4: memref<128x128xf32, #tpu.memory_space<vmem>>, %arg5: memref<1x128xf32, #tpu.memory_space<vmem>>, %arg6: memref<200x128xf32, #tpu.memory_space<vmem>>) attributes {dimension_semantics = [#tpu.dimension_semantics<parallel>], iteration_bounds = array<i64: 1>, scalar_prefetch = 0 : i64, scratch_operands = 0 : i64, tpu.core_type = #tpu.core_type<tc>, window_params = [{transform_indices = @transform_0, window_bounds = array<i64: 200, 2>}, {pipeline_mode = #tpu.pipeline_mode<synchronous>, transform_indices = @transform_1, window_bounds = array<i64: 2, 128>}, {pipeline_mode = #tpu.pipeline_mode<synchronous>, transform_indices = @transform_2, window_bounds = array<i64: 1, 128>}, {pipeline_mode = #tpu.pipeline_mode<synchronous>, transform_indices = @transform_3, window_bounds = array<i64: 128, 128>}, {pipeline_mode = #tpu.pipeline_mode<synchronous>, transform_indices = @transform_4, window_bounds = array<i64: 1, 128>}, {transform_indices = @transform_5, window_bounds = array<i64: 200, 128>}]} {
    %c0 = arith.constant 0 : index
    %c0_0 = arith.constant 0 : index
    %0 = vector.load %arg1[%c0, %c0_0] : memref<200x2xf32, #tpu.memory_space<vmem>>, vector<200x2xf32>
    %c0_1 = arith.constant 0 : index
    %c0_2 = arith.constant 0 : index
    %1 = vector.load %arg2[%c0_1, %c0_2] : memref<2x128xf32, #tpu.memory_space<vmem>>, vector<2x128xf32>
    %2 = vector.extract_strided_slice %0 {offsets = [0, 0], sizes = [200, 1], strides = [1, 1]} : vector<200x2xf32> to vector<200x1xf32>
    %3 = vector.extract_strided_slice %0 {offsets = [0, 1], sizes = [200, 1], strides = [1, 1]} : vector<200x2xf32> to vector<200x1xf32>
    %4 = vector.extract_strided_slice %1 {offsets = [0, 0], sizes = [1, 128], strides = [1, 1]} : vector<2x128xf32> to vector<1x128xf32>
    %5 = vector.extract_strided_slice %1 {offsets = [1, 0], sizes = [1, 128], strides = [1, 1]} : vector<2x128xf32> to vector<1x128xf32>
    %c0_3 = arith.constant 0 : index
    %c0_4 = arith.constant 0 : index
    %6 = vector.load %arg3[%c0_3, %c0_4] : memref<1x128xf32, #tpu.memory_space<vmem>>, vector<1x128xf32>
    %7 = vector.broadcast %2 : vector<200x1xf32> to vector<200x128xf32>
    %8 = vector.broadcast %4 : vector<1x128xf32> to vector<200x128xf32>
    %9 = arith.mulf %7, %8 : vector<200x128xf32>
    %10 = vector.broadcast %6 : vector<1x128xf32> to vector<200x128xf32>
    %11 = arith.addf %10, %9 : vector<200x128xf32>
    %12 = vector.broadcast %3 : vector<200x1xf32> to vector<200x128xf32>
    %13 = vector.broadcast %5 : vector<1x128xf32> to vector<200x128xf32>
    %14 = arith.mulf %12, %13 : vector<200x128xf32>
    %15 = arith.addf %11, %14 : vector<200x128xf32>
    %cst = arith.constant 0.000000e+00 : f32
    %16 = vector.broadcast %cst : f32 to vector<200x128xf32>
    %17 = arith.maximumf %15, %16 : vector<200x128xf32>
    %c0_5 = arith.constant 0 : index
    %c0_6 = arith.constant 0 : index
    %18 = vector.load %arg4[%c0_5, %c0_6] : memref<128x128xf32, #tpu.memory_space<vmem>>, vector<128x128xf32>
    %cst_7 = arith.constant dense<0.000000e+00> : vector<200x128xf32>
    %19 = tpu.matmul %17, %18, %cst_7 {dimension_numbers = #tpu.dot_dimension_numbers<[1], [0], [0], [1], [0, 0, 1, 1], [], []>} : vector<200x128xf32>, vector<128x128xf32>, vector<200x128xf32> -> vector<200x128xf32>
    %c0_8 = arith.constant 0 : index
    %c0_9 = arith.constant 0 : index
    %20 = vector.load %arg5[%c0_8, %c0_9] : memref<1x128xf32, #tpu.memory_space<vmem>>, vector<1x128xf32>
    %21 = vector.broadcast %20 : vector<1x128xf32> to vector<200x128xf32>
    %22 = arith.addf %19, %21 : vector<200x128xf32>
    %c0_10 = arith.constant 0 : index
    %c0_11 = arith.constant 0 : index
    %23 = vector.load %arg6[%c0_10, %c0_11] : memref<200x128xf32, #tpu.memory_space<vmem>>, vector<200x128xf32>
    tpu.vector_store %arg6[%c0_10, %c0_11], %22 {strides = array<i32>} : memref<200x128xf32, #tpu.memory_space<vmem>>, vector<200x128xf32>,
    return
  }
  func.func @transform_0(%arg0: i32) -> (i32, i32) {
    %c0_i32 = arith.constant 0 : i32
    %c0_i32_0 = arith.constant 0 : i32
    return %arg0, %c0_i32 : i32, i32
  }
  func.func @transform_1(%arg0: i32) -> (i32, i32) {
    %c0_i32 = arith.constant 0 : i32
    %c0_i32_0 = arith.constant 0 : i32
    %c0_i32_1 = arith.constant 0 : i32
    return %c0_i32, %c0_i32_0 : i32, i32
  }
  func.func @transform_2(%arg0: i32) -> (i32, i32) {
    %c0_i32 = arith.constant 0 : i32
    %c0_i32_0 = arith.constant 0 : i32
    %c0_i32_1 = arith.constant 0 : i32
    return %c0_i32, %c0_i32_0 : i32, i32
  }
  func.func @transform_3(%arg0: i32) -> (i32, i32) {
    %c0_i32 = arith.constant 0 : i32
    %c0_i32_0 = arith.constant 0 : i32
    %c0_i32_1 = arith.constant 0 : i32
    return %c0_i32, %c0_i32_0 : i32, i32
  }
  func.func @transform_4(%arg0: i32) -> (i32, i32) {
    %c0_i32 = arith.constant 0 : i32
    %c0_i32_0 = arith.constant 0 : i32
    %c0_i32_1 = arith.constant 0 : i32
    return %c0_i32, %c0_i32_0 : i32, i32
  }
  func.func @transform_5(%arg0: i32) -> (i32, i32) {
    %c0_i32 = arith.constant 0 : i32
    %c0_i32_0 = arith.constant 0 : i32
    return %arg0, %c0_i32 : i32, i32
  }
}

</mosaic_0001>

<bundles_post_ra>
// kernel: _cmodel_pallas.1
= control target key start
LH: loop header
LB: loop body
LE: loop exit
PB: predicated region body
PF: predicated region fallthrough
CT: control target
= control target key end

     0   :  { %v867_v0 = vmov 0   ;;  %v868_v4 = vmov 0.0   ;;  %v869_v5 = vmov 1   ;;  %vm870_vm0 = vmmov 0   ;;  %s1359_s0 = inlined_call_operand.vmem [shape: f32[200,2], index: 0, kind: input, shape index: {}]   ;;  %s1360_s3 = inlined_call_operand.vmem [shape: f32[128,128], index: 3, kind: input, shape index: {}]   ;;  %s1361_s1 = inlined_call_operand.vmem [shape: f32[2,128], index: 1, kind: input, shape index: {}]   ;;  %s1362_s2 = inlined_call_operand.vmem [shape: f32[1,128], index: 2, kind: input, shape index: {}]   ;;  %s1363_s4 = inlined_call_operand.vmem [shape: f32[1,128], index: 4, kind: input, shape index: {}]   ;;  %s1364_s5 = inlined_call_operand.vmem [shape: f32[200,128], index: 5, kind: output, shape index: {}]  }
   0x1   :  { %841 = vset.pattern.permute.xlu1 %v867_v0  ;;  %839 = vset.pattern.permute.xlu0 %v867_v0  ;;  %v21_v1 = vld [vmem:[%s1359_s0 + $0x8] sm:$0xff]  ;;  %v20_v2 = vld [vmem:[%s1359_s0] sm:$0xff]  ;;  %v426_v6 = vld [vmem:[%s1360_s3 + $0x78] sm:$0xff]  ;;  %v172_v42 = vlaneseq }
   0x2   :  { %54 = vperm.xlu1 %841, %v21_v1   ;;  %49 = vperm.xlu0 %839, %v20_v2   ;;  %v33_v3 = vld [vmem:[%s1359_s0 + $0x68] sm:$0xff]  ;;  %v425_v7 = vld [vmem:[%s1360_s3 + $0x70] sm:$0xff]  ;;  %v933_v9 = vld [vmem:[%s1359_s0 + $0x18] sm:$0xff] }
   0x3   :  { %696 = vmatprep.subr.mxu0 %v868_v4  ;;  %803 = vmatprep.subr.mxu1 %v868_v4  ;;  %v424_v8 = vld [vmem:[%s1360_s3 + $0x68] sm:$0xff]  ;;  %v22_v10 = vld [vmem:[%s1359_s0 + $0x10] sm:$0xff]  ;;  %v423_v11 = vld [vmem:[%s1360_s3 + $0x60] sm:$0xff]  ;;  %v173_v43 = vshrl.u32 %v172_v42, 7 }
   0x4   :  { %728 = vmatprep.mubr.msk.f32.mxu0 %vm870_vm0, %v868_v4  ;;  %767 = vmatprep.mubr.msk.f32.mxu1 %vm870_vm0, %v868_v4  ;;  %v949_v12 = vld [vmem:[%s1359_s0 + $0x28] sm:$0xff]  ;;  %v422_v13 = vld [vmem:[%s1360_s3 + $0x58] sm:$0xff]  ;;  %v421_v14 = vld [vmem:[%s1360_s3 + $0x50] sm:$0xff] }
   0x5   :  { %697 = vmatpush3.msra.mxu0 %v426_v6  ;;  %819 = vmatpush3.msra.mxu1 %v426_v6  ;;  %v965_v15 = vld [vmem:[%s1359_s0 + $0x38] sm:$0xff]  ;;  %v420_v16 = vld [vmem:[%s1360_s3 + $0x48] sm:$0xff]  ;;  %v34_v17 = vld [vmem:[%s1359_s0 + $0x70] sm:$0xff]  ;;  %v174_v44 = vsub.s32 0, %v173_v43  ;;  %v334_v47 = vsub.s32 1, %v173_v43 }
   0x6   :  { %114 = vperm.xlu1 %841, %v33_v3   ;;  %840 = vset.pattern.permute.xlu0 %v869_v5  ;;  %v980_v18 = vld [vmem:[%s1359_s0 + $0x48] sm:$0xff]  ;;  %v419_v19 = vld [vmem:[%s1360_s3 + $0x40] sm:$0xff]  ;;  %v35_v20 = vld [vmem:[%s1359_s0 + $0x78] sm:$0xff] }
   0x7   :  { %233 = vperm.xlu0 %840, %v20_v2   ;;  %698 = vmatprep.subr.mxu0 %v868_v4  ;;  %v418_v21 = vld [vmem:[%s1360_s3 + $0x38] sm:$0xff]  ;;  %v417_v23 = vld [vmem:[%s1360_s3 + $0x30] sm:$0xff]  ;;  %v416_v24 = vld [vmem:[%s1360_s3 + $0x28] sm:$0xff] }
   0x8   :  { %699 = vmatpush3.msra.mxu0 %v425_v7  ;;  %804 = vmatprep.subr.mxu1 %v868_v4  ;;  %v997_v22 = vld [vmem:[%s1359_s0 + $0x58] sm:$0xff]  ;;  %v415_v25 = vld [vmem:[%s1360_s3 + $0x20] sm:$0xff]  ;;  %v413_v29 = vld [vmem:[%s1360_s3 + $0x10] sm:$0xff] }
   0x9   :  { %700 = vmatprep.subr.mxu0 %v868_v4  ;;  %820 = vmatpush3.msra.mxu1 %v425_v7  ;;  %v24_v26 = vld [vmem:[%s1359_s0 + $0x20] sm:$0xff]  ;;  %v414_v27 = vld [vmem:[%s1360_s3 + $0x18] sm:$0xff]  ;;  %v412_v30 = vld [vmem:[%s1360_s3 + $0x8] sm:$0xff] }
   0xa   :  { %842 = vset.pattern.permute.xlu1 %v869_v5  ;;  %701 = vmatpush3.msra.mxu0 %v424_v8  ;;  %v36_v28 = vld [vmem:[%s1359_s0 + $0x80] sm:$0xff]  ;;  %v38_v32 = vld [vmem:[%s1359_s0 + $0x90] sm:$0xff]  ;;  %v37_v33 = vld [vmem:[%s1359_s0 + $0x88] sm:$0xff] }
   0xb   :  { %237 = vperm.xlu1 %842, %v21_v1   ;;  %285 = vperm.xlu0 %840, %v33_v3   ;;  %v411_v31 = vld [vmem:[%s1360_s3] sm:$0xff]  ;;  %v26_v35 = vld [vmem:[%s1359_s0 + $0x30] sm:$0xff]  ;;  %v39_v38 = vld [vmem:[%s1359_s0 + $0x98] sm:$0xff] }
   0xc   :  { %805 = vmatprep.subr.mxu1 %v868_v4  ;;  %702 = vmatprep.subr.mxu0 %v868_v4  ;;  %v40_v34 = vld [vmem:[%s1359_s0 + $0xa0] sm:$0xff]  ;;  %v42_v36 = vld [vmem:[%s1359_s0 + $0xb0] sm:$0xff]  ;;  %v41_v40 = vld [vmem:[%s1359_s0 + $0xa8] sm:$0xff] }
   0xd   :  { %703 = vmatpush3.msra.mxu0 %v423_v11  ;;  %821 = vmatpush3.msra.mxu1 %v424_v8  ;;  %v1077_v37 = vld [vmem:[%s1359_s0 + $0xc0] sm:$0xff]  ;;  %v30_v41 = vld [vmem:[%s1359_s0 + $0x50] sm:$0xff]  ;;  %v43_v46 = vld [vmem:[%s1359_s0 + $0xb8] sm:$0xff] }
   0xe   :  { %704 = vmatprep.subr.mxu0 %v868_v4  ;;  %806 = vmatprep.subr.mxu1 %v868_v4  ;;  %v28_v39 = vld [vmem:[%s1359_s0 + $0x40] sm:$0xff] }
   0xf   :  { %843 = vset.pattern.permute.xlu1 %v867_v0  ;;  %245 = vperm.xlu0 %840, %v933_v9   ;;  %v45_v45 = vld [vmem:[%s1361_s1] sm:$0x3] }
  0x10   :  { %59 = vperm.xlu1 %843, %v22_v10   ;;  %705 = vmatpush3.msra.mxu0 %v422_v13  ;;  %v1107_v48 = vrot.slane %v45_v45, %v174_v44  ;;  %v1111_v52 = vrot.slane %v45_v45, %v334_v47  ;;  %v1116_v53 = vld [vmem:[%s1362_s2] ss:$0 sm:$0xff] }
  0x11   :  { %706 = vmatprep.subr.mxu0 %v868_v4  ;;  %822 = vmatpush3.msra.mxu1 %v423_v11  ;;  %v32_v61 = vld [vmem:[%s1359_s0 + $0x60] sm:$0xff] }
  0x12   :  { %707 = vmatpush3.msra.mxu0 %v421_v14  ;;  %807 = vmatprep.subr.mxu1 %v868_v4 }
  0x13   :  { %253 = vperm.xlu0 %840, %v949_v12   ;;  %708 = vmatprep.subr.mxu0 %v868_v4 }
  0x14   :  { %844 = vset.pattern.permute.xlu1 %v869_v5  ;;  %823 = vmatpush3.msra.mxu1 %v422_v13 }
  0x15   :  { %241 = vperm.xlu1 %844, %v22_v10   ;;  %709 = vmatpush3.msra.mxu0 %v420_v16 }
  0x16   :  { %808 = vmatprep.subr.mxu1 %v868_v4  ;;  %710 = vmatprep.subr.mxu0 %v868_v4 }
  0x17   :  { %261 = vperm.xlu0 %840, %v965_v15   ;;  %824 = vmatpush3.msra.mxu1 %v421_v14 }
  0x18   :  { %711 = vmatpush3.msra.mxu0 %v419_v19  ;;  %809 = vmatprep.subr.mxu1 %v868_v4 }
  0x19   :  { %289 = vperm.xlu1 %844, %v34_v17   ;;  %712 = vmatprep.subr.mxu0 %v868_v4 }
  0x1a   :  { %825 = vmatpush3.msra.mxu1 %v420_v16  ;;  %713 = vmatpush3.msra.mxu0 %v418_v21 }
  0x1b   :  { %269 = vperm.xlu0 %840, %v980_v18   ;;  %810 = vmatprep.subr.mxu1 %v868_v4 }
  0x1c   :  { %714 = vmatprep.subr.mxu0 %v868_v4  ;;  %826 = vmatpush3.msra.mxu1 %v419_v19 }
  0x1d   :  { %845 = vset.pattern.permute.xlu1 %v867_v0  ;;  %715 = vmatpush3.msra.mxu0 %v417_v23 }
  0x1e   :  { %124 = vperm.xlu1 %845, %v35_v20   ;;  %811 = vmatprep.subr.mxu1 %v868_v4 }
  0x1f   :  { %277 = vperm.xlu0 %840, %v997_v22   ;;  %716 = vmatprep.subr.mxu0 %v868_v4 }
  0x20   :  { %827 = vmatpush3.msra.mxu1 %v418_v21  ;;  %717 = vmatpush3.msra.mxu0 %v416_v24 }
  0x21   :  { %812 = vmatprep.subr.mxu1 %v868_v4  ;;  %718 = vmatprep.subr.mxu0 %v868_v4 }
  0x22   :  { %846 = vset.pattern.permute.xlu1 %v869_v5  ;;  %828 = vmatpush3.msra.mxu1 %v417_v23 }
  0x23   :  { %293 = vperm.xlu1 %846, %v35_v20   ;;  %862 = vset.pattern.permute.xlu0 %v867_v0 }
  0x24   :  { %119 = vperm.xlu0 %862, %v34_v17   ;;  %719 = vmatpush3.msra.mxu0 %v415_v25 }
  0x25   :  { %813 = vmatprep.subr.mxu1 %v868_v4  ;;  %720 = vmatprep.subr.mxu0 %v868_v4 }
  0x26   :  { %829 = vmatpush3.msra.mxu1 %v416_v24  ;;  %721 = vmatpush3.msra.mxu0 %v414_v27 }
  0x27   :  { %847 = vset.pattern.permute.xlu1 %v867_v0  ;;  %814 = vmatprep.subr.mxu1 %v868_v4 }
  0x28   :  { %69 = vperm.xlu1 %847, %v24_v26   ;;  %64 = vperm.xlu0 %862, %v933_v9  }
  0x29   :  { %722 = vmatprep.subr.mxu0 %v868_v4  ;;  %830 = vmatpush3.msra.mxu1 %v415_v25 }
  0x2a   :  { %723 = vmatpush3.msra.mxu0 %v413_v29  ;;  %815 = vmatprep.subr.mxu1 %v868_v4 }
  0x2b   :  { %724 = vmatprep.subr.mxu0 %v868_v4  ;;  %831 = vmatpush3.msra.mxu1 %v414_v27 }
  0x2c   :  { %848 = vset.pattern.permute.xlu1 %v869_v5  ;;  %129 = vperm.xlu0 %862, %v36_v28  }
  0x2d   :  { %249 = vperm.xlu1 %848, %v24_v26   ;;  %725 = vmatpush3.msra.mxu0 %v412_v30 }
  0x2e   :  { %816 = vmatprep.subr.mxu1 %v868_v4  ;;  %726 = vmatprep.subr.mxu0 %v868_v4 }
  0x2f   :  { %832 = vmatpush3.msra.mxu1 %v413_v29  ;;  %727 = vmatpush3.msra.mxu0 %v411_v31 }
  0x30   :  { %74 = vperm.xlu0 %862, %v949_v12   ;;  %817 = vmatprep.subr.mxu1 %v868_v4 }
  0x31   :  { %297 = vperm.xlu1 %848, %v36_v28   ;;  %833 = vmatpush3.msra.mxu1 %v412_v30 }
  0x32   :  { %818 = vmatprep.subr.mxu1 %v868_v4 }
  0x33   :  { %834 = vmatpush3.msra.mxu1 %v411_v31 }
  0x34   :  { %139 = vperm.xlu0 %862, %v38_v32  }
  0x35   :  { %849 = vset.pattern.permute.xlu1 %v867_v0 }
  0x36   :  { %134 = vperm.xlu1 %849, %v37_v33  }
  0x38   :  { %84 = vperm.xlu0 %862, %v965_v15  }
  0x3a   :  { %850 = vset.pattern.permute.xlu1 %v869_v5 }
  0x3b   :  { %301 = vperm.xlu1 %850, %v37_v33  }
  0x3c   :  { %149 = vperm.xlu0 %862, %v40_v34  }
  0x3f   :  { %851 = vset.pattern.permute.xlu1 %v867_v0 }
  0x40   :  { %79 = vperm.xlu1 %851, %v26_v35   ;;  %94 = vperm.xlu0 %862, %v980_v18  }
  0x44   :  { %852 = vset.pattern.permute.xlu1 %v869_v5  ;;  %159 = vperm.xlu0 %862, %v42_v36  }
  0x45   :  { %257 = vperm.xlu1 %852, %v26_v35  }
  0x48   :  { %104 = vperm.xlu0 %862, %v997_v22  }
  0x49   :  { %305 = vperm.xlu1 %852, %v38_v32  }
  0x4c   :  { %169 = vperm.xlu0 %862, %v1077_v37  }
  0x4d   :  { %853 = vset.pattern.permute.xlu1 %v867_v0 }
  0x4e   :  { %144 = vperm.xlu1 %853, %v39_v38  }
  0x50   :  { %866 = vset.pattern.permute.xlu0 %v869_v5 }
  0x52   :  { %854 = vset.pattern.permute.xlu1 %v869_v5 }
  0x53   :  { %309 = vperm.xlu1 %854, %v39_v38  }
  0x57   :  { %855 = vset.pattern.permute.xlu1 %v867_v0 }
  0x58   :  { %89 = vperm.xlu1 %855, %v28_v39  }
  0x5c   :  { %856 = vset.pattern.permute.xlu1 %v869_v5 }
  0x5d   :  { %265 = vperm.xlu1 %856, %v28_v39  }
  0x61   :  { %313 = vperm.xlu1 %856, %v40_v34  }
  0x65   :  { %857 = vset.pattern.permute.xlu1 %v867_v0 }
  0x66   :  { %154 = vperm.xlu1 %857, %v41_v40  }
  0x6a   :  { %858 = vset.pattern.permute.xlu1 %v869_v5 }
  0x6b   :  { %317 = vperm.xlu1 %858, %v41_v40  }
  0x6f   :  { %859 = vset.pattern.permute.xlu1 %v867_v0 }
  0x70   :  { %99 = vperm.xlu1 %859, %v30_v41  }
  0x74   :  { %860 = vset.pattern.permute.xlu1 %v869_v5 }
  0x75   :  { %273 = vperm.xlu1 %860, %v30_v41  }
  0x79   :  { %321 = vperm.xlu1 %860, %v42_v36  }
  0x7d   :  { %861 = vset.pattern.permute.xlu1 %v867_v0  ;;  %v55_v49 = vpop.permute.xlu1 %54  ;;  %v50_v50 = vpop.permute.xlu0 %49 }
  0x7e   :  { %164 = vperm.xlu1 %861, %v43_v46   ;;  %v176_v51 = vmul.f32 %v1107_v48, %v50_v50  ;;  %v177_v56 = vmul.f32 %v1107_v48, %v55_v49 }
  0x80   :  { %v207_v54 = vadd.f32 %v1116_v53, %v176_v51  ;;  %v208_v62 = vadd.f32 %v1116_v53, %v177_v56 }
  0x81   :  { %v115_v55 = vpop.permute.xlu1 %114 }
  0x82   :  { %863 = vset.pattern.permute.xlu1 %v869_v5  ;;  %v234_v57 = vpop.permute.xlu0 %233  ;;  %v189_v58 = vmul.f32 %v1107_v48, %v115_v55 }
  0x83   :  { %v336_v59 = vmul.f32 %v1111_v52, %v234_v57  ;;  %325 = vperm.xlu1 %863, %v43_v46  }
  0x84   :  { %v220_v2 = vadd.f32 %v1116_v53, %v189_v58 }
  0x85   :  { %v361_v60 = vadd.f32 %v336_v59, %v207_v54 }
  0x86   :  { %v238_v63 = vpop.permute.xlu1 %237  ;;  %v286_v1 = vpop.permute.xlu0 %285 }
  0x87   :  { %v386_v3 = vmax.f32 %v361_v60, 0.0  ;;  %v337_v6 = vmul.f32 %v1111_v52, %v238_v63  ;;  %v349_v7 = vmul.f32 %v1111_v52, %v286_v1  ;;  %864 = vset.pattern.permute.xlu1 %v867_v0 }
  0x88   :  { %109 = vperm.xlu1 %864, %v32_v61  }
  0x89   :  { %v362_v8 = vadd.f32 %v337_v6, %v208_v62  ;;  %v374_v9 = vadd.f32 %v349_v7, %v220_v2  ;;  %729 = vmatmul.mubr.f32.vlgmr.msra.gmra.mxu0 %v386_v3 }
  0x8a   :  { %v246_v10 = vpop.permute.xlu0 %245  ;;  %731 = vmatprep.mubr.msk.f32.mxu0 %vm870_vm0, %v868_v4 }
  0x8b   :  { %v387_v11 = vmax.f32 %v362_v8, 0.0  ;;  %v399_v12 = vmax.f32 %v374_v9, 0.0  ;;  %v60_v13 = vpop.permute.xlu1 %59  ;;  %v339_v33 = vmul.f32 %v1111_v52, %v246_v10 }
  0x8c   :  { %865 = vset.pattern.permute.xlu1 %v869_v5  ;;  %v178_v14 = vmul.f32 %v1107_v48, %v60_v13 }
  0x8d   :  { %281 = vperm.xlu1 %865, %v32_v61   ;;  %732 = vmatmul.mubr.f32.gmra.mxu0 %v387_v11 }
  0x8e   :  { %768 = vmatmul.mubr.f32.vlgmr.msra.gmra.mxu1 %v399_v12  ;;  %v254_v15 = vpop.permute.xlu0 %253  ;;  %734 = vmatprep.mubr.msk.f32.mxu0 %vm870_vm0, %v868_v4  ;;  %v209_v16 = vadd.f32 %v1116_v53, %v178_v14 }
  0x8f   :  { %770 = vmatprep.mubr.msk.f32.mxu1 %vm870_vm0, %v868_v4  ;;  %v341_v55 = vmul.f32 %v1111_v52, %v254_v15 }
  0x90   :  { %v242_v0 = vpop.permute.xlu1 %241 }
  0x91   :  { %v338_v17 = vmul.f32 %v1111_v52, %v242_v0  ;;  %329 = vperm.xlu1 %865, %v1077_v37  }
  0x92   :  { %v1142_v5 = vpop.permute.xlu0 %261 }
  0x93   :  { %v363_v18 = vadd.f32 %v338_v17, %v209_v16  ;;  %v343_v0 = vmul.f32 %v1111_v52, %v1142_v5 }
  0x94   :  { %v290_v19 = vpop.permute.xlu1 %289 }
  0x95   :  { %v388_v20 = vmax.f32 %v363_v18, 0.0  ;;  %v350_v28 = vmul.f32 %v1111_v52, %v290_v19 }
  0x96   :  { %v1144_v21 = vpop.permute.xlu0 %269 }
  0x97   :  { %735 = vmatmul.mubr.f32.gmra.mxu0 %v388_v20 }
  0x98   :  { %737 = vmatprep.mubr.msk.f32.mxu0 %vm870_vm0, %v868_v4 }
  0x99   :  { %v125_v22 = vpop.permute.xlu1 %124 }
  0x9a   :  { %v1148_v23 = vpop.permute.xlu0 %277  ;;  %v191_v26 = vmul.f32 %v1107_v48, %v125_v22 }
  0x9c   :  { %v222_v34 = vadd.f32 %v1116_v53, %v191_v26 }
  0x9e   :  { %v294_v24 = vpop.permute.xlu1 %293 }
  0x9f   :  { %v120_v25 = vpop.permute.xlu0 %119  ;;  %v351_v29 = vmul.f32 %v1111_v52, %v294_v24 }
  0xa0   :  { %v190_v27 = vmul.f32 %v1107_v48, %v120_v25 }
  0xa1   :  { %v376_v38 = vadd.f32 %v351_v29, %v222_v34 }
  0xa2   :  { %v221_v30 = vadd.f32 %v1116_v53, %v190_v27 }
  0xa3   :  { %v70_v31 = vpop.permute.xlu1 %69  ;;  %v65_v32 = vpop.permute.xlu0 %64  ;;  %v401_v47 = vmax.f32 %v376_v38, 0.0 }
  0xa4   :  { %v179_v35 = vmul.f32 %v1107_v48, %v65_v32  ;;  %v375_v36 = vadd.f32 %v350_v28, %v221_v30  ;;  %v180_v37 = vmul.f32 %v1107_v48, %v70_v31 }
  0xa6   :  { %v210_v39 = vadd.f32 %v1116_v53, %v179_v35  ;;  %v400_v40 = vmax.f32 %v375_v36, 0.0  ;;  %v211_v45 = vadd.f32 %v1116_v53, %v180_v37 }
  0xa7   :  { %v130_v41 = vpop.permute.xlu0 %129 }
  0xa8   :  { %v192_v42 = vmul.f32 %v1107_v48, %v130_v41  ;;  %v250_v43 = vpop.permute.xlu1 %249  ;;  %771 = vmatmul.mubr.f32.gmra.mxu1 %v400_v40  ;;  %v364_v44 = vadd.f32 %v339_v33, %v210_v39 }
  0xa9   :  { %v340_v46 = vmul.f32 %v1111_v52, %v250_v43  ;;  %773 = vmatprep.mubr.msk.f32.mxu1 %vm870_vm0, %v868_v4 }
  0xaa   :  { %v389_v49 = vmax.f32 %v364_v44, 0.0  ;;  %v223_v50 = vadd.f32 %v1116_v53, %v192_v42 }
  0xab   :  { %v365_v51 = vadd.f32 %v340_v46, %v211_v45  ;;  %v75_v54 = vpop.permute.xlu0 %74  ;;  %v345_v45 = vmul.f32 %v1111_v52, %v1144_v21 }
  0xac   :  { %v181_v56 = vmul.f32 %v1107_v48, %v75_v54  ;;  %v298_v57 = vpop.permute.xlu1 %297  ;;  %738 = vmatmul.mubr.f32.gmra.mxu0 %v389_v49  ;;  %774 = vmatmul.mubr.f32.gmra.mxu1 %v401_v47 }
  0xad   :  { %v390_v58 = vmax.f32 %v365_v51, 0.0  ;;  %v352_v59 = vmul.f32 %v1111_v52, %v298_v57  ;;  %740 = vmatprep.mubr.msk.f32.mxu0 %vm870_vm0, %v868_v4  ;;  %776 = vmatprep.mubr.msk.f32.mxu1 %vm870_vm0, %v868_v4 }
  0xae   :  { %v212_v60 = vadd.f32 %v1116_v53, %v181_v56 }
  0xaf   :  { %v377_v61 = vadd.f32 %v352_v59, %v223_v50  ;;  %v140_v6 = vpop.permute.xlu0 %139 }
  0xb0   :  { %741 = vmatmul.mubr.f32.gmra.mxu0 %v390_v58  ;;  %v366_v62 = vadd.f32 %v341_v55, %v212_v60  ;;  %v194_v16 = vmul.f32 %v1107_v48, %v140_v6 }
  0xb1   :  { %v402_v63 = vmax.f32 %v377_v61, 0.0  ;;  %v135_v1 = vpop.permute.xlu1 %134  ;;  %743 = vmatprep.mubr.msk.f32.mxu0 %vm870_vm0, %v868_v4 }
  0xb2   :  { %v391_v2 = vmax.f32 %v366_v62, 0.0  ;;  %v193_v3 = vmul.f32 %v1107_v48, %v135_v1  ;;  %v225_v22 = vadd.f32 %v1116_v53, %v194_v16 }
  0xb3   :  { %777 = vmatmul.mubr.f32.gmra.mxu1 %v402_v63  ;;  %v85_v11 = vpop.permute.xlu0 %84 }
  0xb4   :  { %779 = vmatprep.mubr.msk.f32.mxu1 %vm870_vm0, %v868_v4  ;;  %744 = vmatmul.mubr.f32.gmra.mxu0 %v391_v2  ;;  %v224_v8 = vadd.f32 %v1116_v53, %v193_v3  ;;  %v183_v12 = vmul.f32 %v1107_v48, %v85_v11  ;;  %v347_v11 = vmul.f32 %v1111_v52, %v1148_v23 }
  0xb5   :  { %746 = vmatprep.mubr.msk.f32.mxu0 %vm870_vm0, %v868_v4 }
  0xb6   :  { %v302_v7 = vpop.permute.xlu1 %301  ;;  %v214_v17 = vadd.f32 %v1116_v53, %v183_v12 }
  0xb7   :  { %v353_v9 = vmul.f32 %v1111_v52, %v302_v7  ;;  %v150_v33 = vpop.permute.xlu0 %149 }
  0xb8   :  { %v368_v25 = vadd.f32 %v343_v0, %v214_v17  ;;  %v196_v43 = vmul.f32 %v1107_v48, %v150_v33 }
  0xb9   :  { %v378_v10 = vadd.f32 %v353_v9, %v224_v8 }
  0xba   :  { %v393_v5 = vmax.f32 %v368_v25, 0.0  ;;  %v227_v50 = vadd.f32 %v1116_v53, %v196_v43 }
  0xbb   :  { %v403_v13 = vmax.f32 %v378_v10, 0.0  ;;  %v80_v14 = vpop.permute.xlu1 %79  ;;  %v95_v40 = vpop.permute.xlu0 %94 }
  0xbc   :  { %v182_v15 = vmul.f32 %v1107_v48, %v80_v14  ;;  %v185_v41 = vmul.f32 %v1107_v48, %v95_v40 }
  0xbd   :  { %780 = vmatmul.mubr.f32.gmra.mxu1 %v403_v13 }
  0xbe   :  { %782 = vmatprep.mubr.msk.f32.mxu1 %vm870_vm0, %v868_v4  ;;  %v213_v19 = vadd.f32 %v1116_v53, %v182_v15  ;;  %v216_v46 = vadd.f32 %v1116_v53, %v185_v41 }
  0xbf   :  { %v160_v62 = vpop.permute.xlu0 %159 }
  0xc0   :  { %v258_v18 = vpop.permute.xlu1 %257  ;;  %v370_v57 = vadd.f32 %v345_v45, %v216_v46  ;;  %v198_v13 = vmul.f32 %v1107_v48, %v160_v62 }
  0xc1   :  { %v342_v20 = vmul.f32 %v1111_v52, %v258_v18 }
  0xc2   :  { %v395_v60 = vmax.f32 %v370_v57, 0.0  ;;  %v229_v18 = vadd.f32 %v1116_v53, %v198_v13 }
  0xc3   :  { %v367_v24 = vadd.f32 %v342_v20, %v213_v19  ;;  %v105_v6 = vpop.permute.xlu0 %104 }
  0xc4   :  { %v306_v26 = vpop.permute.xlu1 %305  ;;  %v187_v9 = vmul.f32 %v1107_v48, %v105_v6 }
  0xc5   :  { %v392_v27 = vmax.f32 %v367_v24, 0.0  ;;  %v354_v28 = vmul.f32 %v1111_v52, %v306_v26 }
  0xc6   :  { %v218_v14 = vadd.f32 %v1116_v53, %v187_v9 }
  0xc7   :  { %v379_v29 = vadd.f32 %v354_v28, %v225_v22  ;;  %747 = vmatmul.mubr.f32.gmra.mxu0 %v392_v27 }
  0xc8   :  { %749 = vmatprep.mubr.msk.f32.mxu0 %vm870_vm0, %v868_v4  ;;  %v372_v22 = vadd.f32 %v347_v11, %v218_v14 }
  0xc9   :  { %v404_v30 = vmax.f32 %v379_v29, 0.0  ;;  %v145_v31 = vpop.permute.xlu1 %144 }
  0xca   :  { %v195_v32 = vmul.f32 %v1107_v48, %v145_v31  ;;  %v397_v26 = vmax.f32 %v372_v22, 0.0 }
  0xcb   :  { %750 = vmatmul.mubr.f32.gmra.mxu0 %v393_v5  ;;  %783 = vmatmul.mubr.f32.gmra.mxu1 %v404_v30 }
  0xcc   :  { %785 = vmatprep.mubr.msk.f32.mxu1 %vm870_vm0, %v868_v4  ;;  %752 = vmatprep.mubr.msk.f32.mxu0 %vm870_vm0, %v868_v4  ;;  %v226_v35 = vadd.f32 %v1116_v53, %v195_v32 }
  0xce   :  { %v310_v34 = vpop.permute.xlu1 %309 }
  0xcf   :  { %v355_v36 = vmul.f32 %v1111_v52, %v310_v34  ;;  %v170_v34 = vpop.permute.xlu0 %169 }
  0xd1   :  { %v380_v37 = vadd.f32 %v355_v36, %v226_v35  ;;  %v200_v36 = vmul.f32 %v1107_v48, %v170_v34 }
  0xd3   :  { %v405_v38 = vmax.f32 %v380_v37, 0.0  ;;  %v90_v39 = vpop.permute.xlu1 %89  ;;  %v231_v41 = vadd.f32 %v1116_v53, %v200_v36 }
  0xd4   :  { %v184_v42 = vmul.f32 %v1107_v48, %v90_v39 }
  0xd5   :  { %786 = vmatmul.mubr.f32.gmra.mxu1 %v405_v38 }
  0xd6   :  { %788 = vmatprep.mubr.msk.f32.mxu1 %vm870_vm0, %v868_v4  ;;  %v215_v47 = vadd.f32 %v1116_v53, %v184_v42 }
  0xd8   :  { %v266_v44 = vpop.permute.xlu1 %265 }
  0xd9   :  { %v344_v49 = vmul.f32 %v1111_v52, %v266_v44 }
  0xdb   :  { %v369_v51 = vadd.f32 %v344_v49, %v215_v47 }
  0xdc   :  { %v314_v54 = vpop.permute.xlu1 %313 }
  0xdd   :  { %v394_v55 = vmax.f32 %v369_v51, 0.0  ;;  %v356_v56 = vmul.f32 %v1111_v52, %v314_v54 }
  0xdf   :  { %v381_v58 = vadd.f32 %v356_v56, %v227_v50  ;;  %753 = vmatmul.mubr.f32.gmra.mxu0 %v394_v55 }
  0xe0   :  { %755 = vmatprep.mubr.msk.f32.mxu0 %vm870_vm0, %v868_v4 }
  0xe1   :  { %v406_v21 = vmax.f32 %v381_v58, 0.0  ;;  %v155_v59 = vpop.permute.xlu1 %154 }
  0xe2   :  { %v197_v61 = vmul.f32 %v1107_v48, %v155_v59 }
  0xe3   :  { %756 = vmatmul.mubr.f32.gmra.mxu0 %v395_v60  ;;  %789 = vmatmul.mubr.f32.gmra.mxu1 %v406_v21 }
  0xe4   :  { %791 = vmatprep.mubr.msk.f32.mxu1 %vm870_vm0, %v868_v4  ;;  %758 = vmatprep.mubr.msk.f32.mxu0 %vm870_vm0, %v868_v4  ;;  %v228_v1 = vadd.f32 %v1116_v53, %v197_v61 }
  0xe6   :  { %v318_v63 = vpop.permute.xlu1 %317 }
  0xe7   :  { %v357_v2 = vmul.f32 %v1111_v52, %v318_v63 }
  0xe9   :  { %v382_v3 = vadd.f32 %v357_v2, %v228_v1 }
  0xeb   :  { %v407_v7 = vmax.f32 %v382_v3, 0.0  ;;  %v100_v8 = vpop.permute.xlu1 %99 }
  0xec   :  { %v186_v10 = vmul.f32 %v1107_v48, %v100_v8 }
  0xed   :  { %792 = vmatmul.mubr.f32.gmra.mxu1 %v407_v7 }
  0xee   :  { %794 = vmatprep.mubr.msk.f32.mxu1 %vm870_vm0, %v868_v4  ;;  %v217_v15 = vadd.f32 %v1116_v53, %v186_v10 }
  0xf0   :  { %v274_v12 = vpop.permute.xlu1 %273 }
  0xf1   :  { %v346_v0 = vmul.f32 %v1111_v52, %v274_v12 }
  0xf3   :  { %v371_v16 = vadd.f32 %v346_v0, %v217_v15 }
  0xf4   :  { %v322_v17 = vpop.permute.xlu1 %321 }
  0xf5   :  { %v396_v19 = vmax.f32 %v371_v16, 0.0  ;;  %v358_v20 = vmul.f32 %v1111_v52, %v322_v17 }
  0xf7   :  { %v383_v24 = vadd.f32 %v358_v20, %v229_v18  ;;  %759 = vmatmul.mubr.f32.gmra.mxu0 %v396_v19 }
  0xf8   :  { %761 = vmatprep.mubr.msk.f32.mxu0 %vm870_vm0, %v868_v4 }
  0xf9   :  { %v408_v23 = vmax.f32 %v383_v24, 0.0  ;;  %v165_v25 = vpop.permute.xlu1 %164 }
  0xfa   :  { %v199_v27 = vmul.f32 %v1107_v48, %v165_v25 }
  0xfb   :  { %762 = vmatmul.mubr.f32.gmra.mxu0 %v397_v26  ;;  %795 = vmatmul.mubr.f32.gmra.mxu1 %v408_v23 }
  0xfc   :  { %797 = vmatprep.mubr.msk.f32.mxu1 %vm870_vm0, %v868_v4  ;;  %764 = vmatprep.mubr.msk.f32.mxu0 %vm870_vm0, %v868_v4  ;;  %v230_v29 = vadd.f32 %v1116_v53, %v199_v27 }
  0xfe   :  { %v326_v28 = vpop.permute.xlu1 %325 }
  0xff   :  { %v359_v5 = vmul.f32 %v1111_v52, %v326_v28 }
 0x101   :  { %v384_v30 = vadd.f32 %v359_v5, %v230_v29 }
 0x103   :  { %v409_v31 = vmax.f32 %v384_v30, 0.0  ;;  %v110_v32 = vpop.permute.xlu1 %109 }
 0x104   :  { %v188_v33 = vmul.f32 %v1107_v48, %v110_v32 }
 0x105   :  { %798 = vmatmul.mubr.f32.gmra.mxu1 %v409_v31 }
 0x106   :  { %800 = vmatprep.mubr.msk.f32.mxu1 %vm870_vm0, %v868_v4  ;;  %v219_v37 = vadd.f32 %v1116_v53, %v188_v33  ;;  %v1257_v4 = vld [vmem:[%s1363_s4] ss:$0 sm:$0xff] }
 0x108   :  { %v282_v35 = vpop.permute.xlu1 %281 }
 0x109   :  { %v348_v38 = vmul.f32 %v1111_v52, %v282_v35 }
 0x10b   :  { %v373_v39 = vadd.f32 %v348_v38, %v219_v37 }
 0x10c   :  { %v330_v40 = vpop.permute.xlu1 %329 }
 0x10d   :  { %v398_v42 = vmax.f32 %v373_v39, 0.0  ;;  %v360_v43 = vmul.f32 %v1111_v52, %v330_v40 }
 0x10f   :  { %v385_v44 = vadd.f32 %v360_v43, %v231_v41  ;;  %765 = vmatmul.mubr.f32.gmra.mxu0 %v398_v42 }
 0x111   :  { %v410_v45 = vmax.f32 %v385_v44, 0.0 }
 0x113   :  { %801 = vmatmul.mubr.f32.gmra.mxu1 %v410_v45 }
 0x149   :  { %v500_v48 = vpop.f32.mrf.mxu0 }
 0x14a   :  { %v501_v46 = vadd.f32 %v1257_v4, %v500_v48 }
 0x14b   :  { %v730_v47 = vpop.f32.mrf.mxu0 }
 0x14c   :  { %624 = vst [vmem:[%s1364_s5] sm:$0xff] %v501_v46 }
 0x14d   :  { %v505_v53 = vpop.f32.mrf.mxu0 }
 0x14e   :  { %v506_v52 = vadd.f32 %v1257_v4, %v505_v53  ;;  %v565_v49 = vpop.f32.mrf.mxu1 }
 0x14f   :  { %v566_v50 = vadd.f32 %v1257_v4, %v565_v49  ;;  %v733_v51 = vpop.f32.mrf.mxu0 }
 0x150   :  { %625 = vst [vmem:[%s1364_s5 + $0x8] sm:$0xff] %v506_v52  ;;  %v769_v54 = vpop.f32.mrf.mxu1 }
 0x151   :  { %637 = vst [vmem:[%s1364_s5 + $0x68] sm:$0xff] %v566_v50 }
 0x157   :  { %v510_v55 = vpop.f32.mrf.mxu0 }
 0x158   :  { %v511_v56 = vadd.f32 %v1257_v4, %v510_v55 }
 0x159   :  { %v736_v57 = vpop.f32.mrf.mxu0 }
 0x15a   :  { %626 = vst [vmem:[%s1364_s5 + $0x10] sm:$0xff] %v511_v56 }
 0x168   :  { %v570_v58 = vpop.f32.mrf.mxu1 }
 0x169   :  { %v571_v21 = vadd.f32 %v1257_v4, %v570_v58 }
 0x16a   :  { %v772_v59 = vpop.f32.mrf.mxu1 }
 0x16b   :  { %638 = vst [vmem:[%s1364_s5 + $0x70] sm:$0xff] %v571_v21 }
 0x16c   :  { %v515_v60 = vpop.f32.mrf.mxu0  ;;  %v575_v61 = vpop.f32.mrf.mxu1 }
 0x16d   :  { %v516_v62 = vadd.f32 %v1257_v4, %v515_v60  ;;  %v576_v63 = vadd.f32 %v1257_v4, %v575_v61 }
 0x16e   :  { %v739_v1 = vpop.f32.mrf.mxu0  ;;  %v775_v2 = vpop.f32.mrf.mxu1 }
 0x16f   :  { %627 = vst [vmem:[%s1364_s5 + $0x18] sm:$0xff] %v516_v62  ;;  %639 = vst [vmem:[%s1364_s5 + $0x78] sm:$0xff] %v576_v63 }
 0x170   :  { %v520_v3 = vpop.f32.mrf.mxu0 }
 0x171   :  { %v521_v6 = vadd.f32 %v1257_v4, %v520_v3 }
 0x172   :  { %v742_v7 = vpop.f32.mrf.mxu0 }
 0x173   :  { %628 = vst [vmem:[%s1364_s5 + $0x20] sm:$0xff] %v521_v6  ;;  %v580_v8 = vpop.f32.mrf.mxu1 }
 0x174   :  { %v581_v9 = vadd.f32 %v1257_v4, %v580_v8  ;;  %v525_v10 = vpop.f32.mrf.mxu0 }
 0x175   :  { %v778_v11 = vpop.f32.mrf.mxu1  ;;  %v526_v12 = vadd.f32 %v1257_v4, %v525_v10 }
 0x176   :  { %640 = vst [vmem:[%s1364_s5 + $0x80] sm:$0xff] %v581_v9  ;;  %v745_v13 = vpop.f32.mrf.mxu0 }
 0x177   :  { %629 = vst [vmem:[%s1364_s5 + $0x28] sm:$0xff] %v526_v12 }
 0x17d   :  { %v585_v14 = vpop.f32.mrf.mxu1 }
 0x17e   :  { %v586_v15 = vadd.f32 %v1257_v4, %v585_v14 }
 0x17f   :  { %v781_v0 = vpop.f32.mrf.mxu1 }
 0x180   :  { %641 = vst [vmem:[%s1364_s5 + $0x88] sm:$0xff] %v586_v15 }
 0x187   :  { %v530_v16 = vpop.f32.mrf.mxu0 }
 0x188   :  { %v531_v17 = vadd.f32 %v1257_v4, %v530_v16 }
 0x189   :  { %v748_v18 = vpop.f32.mrf.mxu0 }
 0x18a   :  { %630 = vst [vmem:[%s1364_s5 + $0x30] sm:$0xff] %v531_v17 }
 0x18b   :  { %v535_v19 = vpop.f32.mrf.mxu0  ;;  %v590_v20 = vpop.f32.mrf.mxu1 }
 0x18c   :  { %v536_v22 = vadd.f32 %v1257_v4, %v535_v19  ;;  %v591_v24 = vadd.f32 %v1257_v4, %v590_v20 }
 0x18d   :  { %v751_v23 = vpop.f32.mrf.mxu0  ;;  %v784_v25 = vpop.f32.mrf.mxu1 }
 0x18e   :  { %631 = vst [vmem:[%s1364_s5 + $0x38] sm:$0xff] %v536_v22  ;;  %642 = vst [vmem:[%s1364_s5 + $0x90] sm:$0xff] %v591_v24 }
 0x195   :  { %v595_v26 = vpop.f32.mrf.mxu1 }
 0x196   :  { %v596_v27 = vadd.f32 %v1257_v4, %v595_v26 }
 0x197   :  { %v787_v28 = vpop.f32.mrf.mxu1 }
 0x198   :  { %643 = vst [vmem:[%s1364_s5 + $0x98] sm:$0xff] %v596_v27 }
 0x19f   :  { %v540_v29 = vpop.f32.mrf.mxu0 }
 0x1a0   :  { %v541_v5 = vadd.f32 %v1257_v4, %v540_v29 }
 0x1a1   :  { %v754_v30 = vpop.f32.mrf.mxu0 }
 0x1a2   :  { %632 = vst [vmem:[%s1364_s5 + $0x40] sm:$0xff] %v541_v5 }
 0x1a3   :  { %v545_v31 = vpop.f32.mrf.mxu0  ;;  %v600_v32 = vpop.f32.mrf.mxu1 }
 0x1a4   :  { %v546_v33 = vadd.f32 %v1257_v4, %v545_v31  ;;  %v601_v34 = vadd.f32 %v1257_v4, %v600_v32 }
 0x1a5   :  { %v757_v35 = vpop.f32.mrf.mxu0  ;;  %v790_v36 = vpop.f32.mrf.mxu1 }
 0x1a6   :  { %633 = vst [vmem:[%s1364_s5 + $0x48] sm:$0xff] %v546_v33  ;;  %644 = vst [vmem:[%s1364_s5 + $0xa0] sm:$0xff] %v601_v34 }
 0x1ad   :  { %v605_v37 = vpop.f32.mrf.mxu1 }
 0x1ae   :  { %v606_v38 = vadd.f32 %v1257_v4, %v605_v37 }
 0x1af   :  { %v793_v39 = vpop.f32.mrf.mxu1 }
 0x1b0   :  { %645 = vst [vmem:[%s1364_s5 + $0xa8] sm:$0xff] %v606_v38 }
 0x1b7   :  { %v550_v40 = vpop.f32.mrf.mxu0 }
 0x1b8   :  { %v551_v41 = vadd.f32 %v1257_v4, %v550_v40 }
 0x1b9   :  { %v760_v42 = vpop.f32.mrf.mxu0 }
 0x1ba   :  { %634 = vst [vmem:[%s1364_s5 + $0x50] sm:$0xff] %v551_v41 }
 0x1bb   :  { %v555_v43 = vpop.f32.mrf.mxu0  ;;  %v610_v44 = vpop.f32.mrf.mxu1 }
 0x1bc   :  { %v556_v45 = vadd.f32 %v1257_v4, %v555_v43  ;;  %v611_v48 = vadd.f32 %v1257_v4, %v610_v44 }
 0x1bd   :  { %v763_v46 = vpop.f32.mrf.mxu0  ;;  %v796_v47 = vpop.f32.mrf.mxu1 }
 0x1be   :  { %635 = vst [vmem:[%s1364_s5 + $0x58] sm:$0xff] %v556_v45  ;;  %646 = vst [vmem:[%s1364_s5 + $0xb0] sm:$0xff] %v611_v48 }
 0x1c5   :  { %v615_v53 = vpop.f32.mrf.mxu1 }
 0x1c6   :  { %v616_v52 = vadd.f32 %v1257_v4, %v615_v53 }
 0x1c7   :  { %v799_v49 = vpop.f32.mrf.mxu1 }
 0x1c8   :  { %647 = vst [vmem:[%s1364_s5 + $0xb8] sm:$0xff] %v616_v52 }
 0x1cf   :  { %v560_v50 = vpop.f32.mrf.mxu0 }
 0x1d0   :  { %v561_v51 = vadd.f32 %v1257_v4, %v560_v50 }
 0x1d1   :  { %v766_v54 = vpop.f32.mrf.mxu0 }
 0x1d2   :  { %636 = vst [vmem:[%s1364_s5 + $0x60] sm:$0xff] %v561_v51 }
 0x1d3   :  { %v620_v55 = vpop.f32.mrf.mxu1 }
 0x1d4   :  { %v621_v56 = vadd.f32 %v1257_v4, %v620_v55 }
 0x1d5   :  { %v802_v57 = vpop.f32.mrf.mxu1 }
 0x1d6   :  { %648 = vst [vmem:[%s1364_s5 + $0xc0] sm:$0xff] %v621_v56 }

</bundles_post_ra>
